<compile_context>
chip_gen: v7x
topology: tpu7x:2x2x1
jax: 0.10.0
libtpu: 0.0.40
codegen_flags: <defaults>
</compile_context>

<pallas_src>
import functools

import jax
import jax.numpy as jnp
from jax import lax
from jax.experimental import pallas as pl
from jax.experimental.pallas import tpu as pltpu


def _round_up(x, m):
    return ((x + m - 1) // m) * m


def _linear_kernel(x_ref, w_ref, b_ref, o_ref, acc_ref, *, compute_dtype):
    # x_ref:   (tm, tk)  VMEM
    # w_ref:   (tn, tk)  VMEM   (weight stored (N, K); NT contraction)
    # b_ref:   (1, tn)   VMEM
    # o_ref:   (tm, tn)  VMEM
    # acc_ref: (tm, tn)  VMEM f32 scratch (persists across the K grid axis)
    k = pl.program_id(2)

    @pl.when(k == 0)
    def _():
        # fold the bias into the accumulator init (broadcast over rows)
        acc_ref[...] = jnp.zeros_like(acc_ref) + b_ref[...].astype(jnp.float32)

    x_t = x_ref[...].astype(compute_dtype)
    w_t = w_ref[...].astype(compute_dtype)
    acc_ref[...] += lax.dot_general(
        x_t, w_t,
        dimension_numbers=(((1,), (1,)), ((), ())),   # x @ w.T on the MXU
        preferred_element_type=jnp.float32,
    )

    @pl.when(k == pl.num_programs(2) - 1)
    def _():
        o_ref[...] = acc_ref[...].astype(o_ref.dtype)


def orthogonal_linear(x, weight, bias, *, tm=256, tn=256, tk=512,
                      compute_dtype=jnp.bfloat16):
    """y = x @ weight.T + bias via a tiled Pallas TPU kernel.

    x:      (M, K) float32
    weight: (N, K) float32
    bias:   (N,)   float32
    """
    M, K = x.shape
    N, K2 = weight.shape
    assert K == K2, "in_features mismatch"
    assert bias.shape == (N,), "bias shape mismatch"

    # Clamp tiles to the (padded) problem; respect (8, 128) tiling granularity.
    tm = min(tm, _round_up(M, 8))
    tn = min(tn, _round_up(N, 128))
    tk = min(tk, _round_up(K, 128))

    Mp, Np, Kp = _round_up(M, tm), _round_up(N, tn), _round_up(K, tk)

    xp = x if (Mp == M and Kp == K) else jnp.pad(x, ((0, Mp - M), (0, Kp - K)))
    wp = weight if (Np == N and Kp == K) else jnp.pad(
        weight, ((0, Np - N), (0, Kp - K)))
    bp = bias if Np == N else jnp.pad(bias, (0, Np - N))
    bp = bp.reshape(1, Np)

    grid = (Mp // tm, Np // tn, Kp // tk)

    kernel = functools.partial(_linear_kernel, compute_dtype=compute_dtype)

    out = pl.pallas_call(
        kernel,
        out_shape=jax.ShapeDtypeStruct((Mp, Np), x.dtype),
        grid_spec=pltpu.PrefetchScalarGridSpec(
            num_scalar_prefetch=0,
            grid=grid,
            in_specs=[
                pl.BlockSpec((tm, tk), lambda i, j, k: (i, k)),  # x row/K tile
                pl.BlockSpec((tn, tk), lambda i, j, k: (j, k)),  # W row/K tile
                pl.BlockSpec((1, tn), lambda i, j, k: (0, j)),   # bias tile
            ],
            out_specs=pl.BlockSpec((tm, tn), lambda i, j, k: (i, j)),
            scratch_shapes=[pltpu.VMEM((tm, tn), jnp.float32)],
        ),
        compiler_params=pltpu.CompilerParams(
            dimension_semantics=("parallel", "parallel", "arbitrary"),
            vmem_limit_bytes=64 * 1024 * 1024,
        ),
        cost_estimate=pl.CostEstimate(
            flops=2 * M * N * K,
            bytes_accessed=(M * K + N * K + N + M * N) * x.dtype.itemsize,
            transcendentals=0,
        ),
    )(xp, wp, bp)

    if Mp != M or Np != N:
        out = out[:M, :N]
    return out


def make_orthogonal_weight(key, out_features, in_features, dtype=jnp.float32):
    """Orthogonal init (QR of a Gaussian, sign-corrected), matching the
    semantics of torch.nn.init.orthogonal_."""
    rows, cols = out_features, in_features
    transpose = rows < cols
    shape = (cols, rows) if transpose else (rows, cols)
    a = jax.random.normal(key, shape, dtype=jnp.float32)
    q, r = jnp.linalg.qr(a)
    d = jnp.sign(jnp.diagonal(r))
    q = q * d[None, :]
    if transpose:
        q = q.T
    return q.astype(dtype)


if __name__ == "__main__":
    key = jax.random.PRNGKey(0)
    k_w, k_b, k_x, k_w2, k_b2, k_x2 = jax.random.split(key, 6)

    # Small shapes consistent with the module's forward.
    batch = 16
    in_features = 64
    out_features = 128

    weight = make_orthogonal_weight(k_w, out_features, in_features)       # (N, K)
    bound = 1.0 / (in_features ** 0.5)                                    # nn.Linear bias init
    bias = jax.random.uniform(k_b, (out_features,), minval=-bound, maxval=bound)
    x = jax.random.normal(k_x, (batch, in_features), dtype=jnp.float32)

    y_ref = x @ weight.T + bias

    # Exact-precision path (f32 compute) — checks tiling / padding / bias fold.
    y32 = orthogonal_linear(x, weight, bias, compute_dtype=jnp.float32)
    y32 = jax.block_until_ready(y32)
    assert y32.shape == (batch, out_features)
    assert jnp.allclose(y32, y_ref, atol=1e-5, rtol=1e-5)

    # Default fast path (bf16 MXU compute, f32 accumulation).
    y = orthogonal_linear(x, weight, bias)
    y = jax.block_until_ready(y)
    assert jnp.allclose(y, y_ref, atol=5e-2, rtol=5e-2)

    # Non-aligned shapes exercise the padding / slicing path.
    M2, K2_, N2 = 10, 50, 70
    w2 = make_orthogonal_weight(k_w2, N2, K2_)
    b2 = jax.random.uniform(k_b2, (N2,), minval=-1.0 / (K2_ ** 0.5),
                            maxval=1.0 / (K2_ ** 0.5))
    x2 = jax.random.normal(k_x2, (M2, K2_), dtype=jnp.float32)
    y2 = jax.block_until_ready(
        orthogonal_linear(x2, w2, b2, compute_dtype=jnp.float32))
    assert y2.shape == (M2, N2)
    assert jnp.allclose(y2, x2 @ w2.T + b2, atol=1e-5, rtol=1e-5)

    print("KERNEL_OK")
</pallas_src>

<mosaic_0001>
module attributes {stable_mosaic.version = 11 : i64} {
  func.func @_linear_kernel(%arg0: i32, %arg1: i32, %arg2: i32, %arg3: memref<16x128xf32, #tpu.memory_space<vmem>>, %arg4: memref<128x128xf32, #tpu.memory_space<vmem>>, %arg5: memref<1x128xf32, #tpu.memory_space<vmem>>, %arg6: memref<16x128xf32, #tpu.memory_space<vmem>>, %arg7: memref<16x128xf32, #tpu.memory_space<vmem>>) attributes {dimension_semantics = [#tpu.dimension_semantics<parallel>, #tpu.dimension_semantics<parallel>, #tpu.dimension_semantics<arbitrary>], iteration_bounds = array<i64: 1, 1, 1>, scalar_prefetch = 0 : i64, scratch_operands = 1 : i64, tpu.core_type = #tpu.core_type<tc>, window_params = [{transform_indices = @transform_0, window_bounds = array<i64: 16, 128>}, {transform_indices = @transform_1, window_bounds = array<i64: 128, 128>}, {transform_indices = @transform_2, window_bounds = array<i64: 1, 128>}, {transform_indices = @transform_3, window_bounds = array<i64: 16, 128>}]} {
    %c0_i32 = arith.constant 0 : i32
    %0 = arith.cmpi eq, %arg2, %c0_i32 : i32
    %1 = arith.extui %0 : i1 to i32
    %c0_i32_0 = arith.constant 0 : i32
    %2 = arith.cmpi ne, %1, %c0_i32_0 : i32
    scf.if %2 {
      %cst_10 = arith.constant 0.000000e+00 : f32
      %12 = vector.broadcast %cst_10 : f32 to vector<16x128xf32>
      %c0_11 = arith.constant 0 : index
      %c0_12 = arith.constant 0 : index
      %13 = vector.load %arg5[%c0_11, %c0_12] : memref<1x128xf32, #tpu.memory_space<vmem>>, vector<1x128xf32>
      %14 = vector.broadcast %13 : vector<1x128xf32> to vector<16x128xf32>
      %15 = arith.addf %12, %14 : vector<16x128xf32>
      %c0_13 = arith.constant 0 : index
      %c0_14 = arith.constant 0 : index
      %16 = vector.load %arg7[%c0_13, %c0_14] : memref<16x128xf32, #tpu.memory_space<vmem>>, vector<16x128xf32>
      tpu.vector_store %arg7[%c0_13, %c0_14], %15 {strides = array<i32>} : memref<16x128xf32, #tpu.memory_space<vmem>>, vector<16x128xf32>,
    } else {
    }
    %c0 = arith.constant 0 : index
    %c0_1 = arith.constant 0 : index
    %3 = vector.load %arg3[%c0, %c0_1] : memref<16x128xf32, #tpu.memory_space<vmem>>, vector<16x128xf32>
    %c0_2 = arith.constant 0 : index
    %c0_3 = arith.constant 0 : index
    %4 = vector.load %arg4[%c0_2, %c0_3] : memref<128x128xf32, #tpu.memory_space<vmem>>, vector<128x128xf32>
    %c0_4 = arith.constant 0 : index
    %c0_5 = arith.constant 0 : index
    %5 = vector.load %arg7[%c0_4, %c0_5] : memref<16x128xf32, #tpu.memory_space<vmem>>, vector<16x128xf32>
    %cst = arith.constant dense<0.000000e+00> : vector<16x128xf32>
    %6 = tpu.matmul %3, %4, %cst {dimension_numbers = #tpu.dot_dimension_numbers<[1], [1], [0], [0], [0, 0, 1, 0], [], []>} : vector<16x128xf32>, vector<128x128xf32>, vector<16x128xf32> -> vector<16x128xf32>
    %7 = arith.addf %5, %6 : vector<16x128xf32>
    %c0_6 = arith.constant 0 : index
    %c0_7 = arith.constant 0 : index
    %8 = vector.load %arg7[%c0_6, %c0_7] : memref<16x128xf32, #tpu.memory_space<vmem>>, vector<16x128xf32>
    tpu.vector_store %arg7[%c0_6, %c0_7], %7 {strides = array<i32>} : memref<16x128xf32, #tpu.memory_space<vmem>>, vector<16x128xf32>,
    %c0_i32_8 = arith.constant 0 : i32
    %9 = arith.cmpi eq, %arg2, %c0_i32_8 : i32
    %10 = arith.extui %9 : i1 to i32
    %c0_i32_9 = arith.constant 0 : i32
    %11 = arith.cmpi ne, %10, %c0_i32_9 : i32
    scf.if %11 {
      %c0_10 = arith.constant 0 : index
      %c0_11 = arith.constant 0 : index
      %12 = vector.load %arg7[%c0_10, %c0_11] : memref<16x128xf32, #tpu.memory_space<vmem>>, vector<16x128xf32>
      %c0_12 = arith.constant 0 : index
      %c0_13 = arith.constant 0 : index
      %13 = vector.load %arg6[%c0_12, %c0_13] : memref<16x128xf32, #tpu.memory_space<vmem>>, vector<16x128xf32>
      tpu.vector_store %arg6[%c0_12, %c0_13], %12 {strides = array<i32>} : memref<16x128xf32, #tpu.memory_space<vmem>>, vector<16x128xf32>,
    } else {
    }
    return
  }
  func.func @transform_0(%arg0: i32, %arg1: i32, %arg2: i32) -> (i32, i32) {
    %c0_i32 = arith.constant 0 : i32
    return %arg0, %arg2 : i32, i32
  }
  func.func @transform_1(%arg0: i32, %arg1: i32, %arg2: i32) -> (i32, i32) {
    %c0_i32 = arith.constant 0 : i32
    return %arg1, %arg2 : i32, i32
  }
  func.func @transform_2(%arg0: i32, %arg1: i32, %arg2: i32) -> (i32, i32) {
    %c0_i32 = arith.constant 0 : i32
    %c0_i32_0 = arith.constant 0 : i32
    return %c0_i32, %arg1 : i32, i32
  }
  func.func @transform_3(%arg0: i32, %arg1: i32, %arg2: i32) -> (i32, i32) {
    %c0_i32 = arith.constant 0 : i32
    return %arg0, %arg1 : i32, i32
  }
}

</mosaic_0001>

<bundles_post_ra>
// kernel: tpu_custom_call.1
= control target key start
LH: loop header
LB: loop body
LE: loop exit
PB: predicated region body
PF: predicated region fallthrough
CT: control target
= control target key end

     0   :  { %8 = vsyncpa [#allocation4], 0  ;;  %s468_s0 = inlined_call_operand.hbm [shape: f32[16,128], index: 0, kind: input, shape index: {}]   ;;  %s469_s1 = inlined_call_operand.hbm [shape: f32[128,128], index: 1, kind: input, shape index: {}]   ;;  %s470_s2 = inlined_call_operand.hbm [shape: f32[1,128], index: 2, kind: input, shape index: {}]   ;;  %s471_s3 = inlined_call_operand.hbm [shape: f32[16,128], index: 3, kind: output, shape index: {}]  }
   0x1   :  { %9 = vsyncpa [#allocation7], 0 }
   0x2   :  { %10 = vsyncpa [#allocation5], 0  ;;  %s378_s12 = smov [#allocation6]   ;;  %s379_s14 = smov [#allocation3]  }
   0x3   :  { %s28_s13 = sshll.u32 %s378_s12, 4  ;;  %s16_s15 = sshll.u32 %s379_s14, 4  ;;  %s29_s13 = int_to_ptr.vmem [resolvable:$true] %s28_s13  ;;  %s404_s15 = int_to_ptr.vmem [resolvable:$true] %s16_s15 }
   0x4   :  { %s284_s18 = scalar_lea.hbm %s469_s1, 2048 }
   0x5   :  { %p285_p0 = scmp.ne.s32.totalorder %s469_s1, %s284_s18  ;;  %p288_p1 = scmp.lt.u32.totalorder %s284_s18, %s469_s1 }
   0x7   :  { %p290_p2 = pnand %p288_p1, %p285_p0 }
   0x9   :  { %293 = shalt.err (!%p290_p2)
}
   0xa   :  { %s294_s23 = scalar_lea.vmem %s29_s13, 2048  ;;  %p299_p4 = scmp.lt.s32.totalorder %s29_s13, %s29_s13 }
   0xb   :  { %p295_p3 = scmp.ne.s32.totalorder %s29_s13, %s294_s23  ;;  %p300_p5 = scmp.lt.s32.totalorder %s294_s23, %s294_s23 }
   0xd   :  { %p301_p6 = por %p300_p5, %p299_p4 }
   0xf   :  { %p302_p7 = pnand %p301_p6, %p295_p3 }
  0x11   :  { %305 = shalt.err (!%p302_p7)
}
  0x12   :  { %s380_s24 = smov 128   ;;  %s381_s25 = smov 8  }
  0x13   :  { %34 = dma.hbm_to_vmem [thread:$0]  %s469_s1, 2048, %s29_s13, [#allocation7], %s380_s24, %s380_s24, %s381_s25  }
  0x14   :  { %s306_s30 = scalar_lea.hbm %s468_s0, 256 }
  0x15   :  { %p307_p8 = scmp.ne.s32.totalorder %s468_s0, %s306_s30  ;;  %p310_p9 = scmp.lt.u32.totalorder %s306_s30, %s468_s0 }
  0x17   :  { %p312_p10 = pnand %p310_p9, %p307_p8 }
  0x19   :  { %315 = shalt.err (!%p312_p10)
}
  0x1a   :  { %s316_s8 = scalar_lea.vmem %s404_s15, 256  ;;  %p321_p12 = scmp.lt.s32.totalorder %s404_s15, %s404_s15 }
  0x1b   :  { %p317_p11 = scmp.ne.s32.totalorder %s404_s15, %s316_s8  ;;  %p322_p13 = scmp.lt.s32.totalorder %s316_s8, %s316_s8 }
  0x1d   :  { %p323_p0 = por %p322_p13, %p321_p12 }
  0x1f   :  { %p324_p1 = pnand %p323_p0, %p317_p11 }
  0x21   :  { %327 = shalt.err (!%p324_p1)
}
  0x22   :  { %22 = dma.hbm_to_vmem [thread:$0]  %s468_s0, 256, %s404_s15, [#allocation4], %s380_s24, %s380_s24, %s381_s25  }
  0x23   :  { %s382_s10 = smov [#allocation8]   ;;  %s328_s14 = scalar_lea.hbm %s470_s2, 16 }
  0x24   :  { %s41_s11 = sshll.u32 %s382_s10, 4  ;;  %p329_p2 = scmp.ne.s32.totalorder %s470_s2, %s328_s14  ;;  %s42_s11 = int_to_ptr.vmem [resolvable:$true] %s41_s11 }
  0x25   :  { %p332_p3 = scmp.lt.u32.totalorder %s328_s14, %s470_s2 }
  0x27   :  { %p334_p4 = pnand %p332_p3, %p329_p2 }
  0x29   :  { %337 = shalt.err (!%p334_p4)
}
  0x2a   :  { %s338_s20 = scalar_lea.vmem %s42_s11, 16  ;;  %s342_s0 = scalar_lea.vmem %s42_s11, 32 }
  0x2b   :  { %p339_p5 = scmp.ne.s32.totalorder %s42_s11, %s338_s20  ;;  %p343_p6 = scmp.lt.s32.totalorder %s42_s11, %s42_s11 }
  0x2c   :  { %p344_p7 = scmp.lt.s32.totalorder %s342_s0, %s338_s20 }
  0x2e   :  { %p345_p8 = por %p344_p7, %p343_p6 }
  0x30   :  { %p346_p9 = pnand %p345_p8, %p339_p5 }
  0x32   :  { %349 = shalt.err (!%p346_p9)
}
  0x33   :  { %44 = dma.hbm_to_vmem [thread:$0]  %s470_s2, 16, %s42_s11, [#allocation7]  }
  0x34   :  { %372 = dma.done.wait [#allocation4], 256  }
  0x35   :  { %373 = vsyncadd [#allocation4], 4294967040 }
  0x36   :  { %374 = dma.done.wait [#allocation7], 2064  }
  0x37   :  { %375 = vsyncadd [#allocation7], 4294965232  ;;  %v70_v0 = vld [vmem:[#allocation6] sm:$0xff]  ;;  %v71_v1 = vld [vmem:[#allocation6 + $0x8] sm:$0xff]  ;;  %s383_s2 = smov [#allocation9]  }
  0x38   :  { %v72_v2 = vld [vmem:[#allocation6 + $0x10] sm:$0xff]  ;;  %v246_v3 = vpack.c.bf16 %v71_v1, %v70_v0  ;;  %v73_v4 = vld [vmem:[#allocation6 + $0x18] sm:$0xff]  ;;  %v74_v7 = vld [vmem:[#allocation6 + $0x20] sm:$0xff]  ;;  %s179_s22 = sshll.u32 %s383_s2, 4  ;;  %s180_s22 = int_to_ptr.vmem [resolvable:$true] %s179_s22 }
  0x39   :  { %v250_v5 = vpack.c.bf16 %v73_v4, %v72_v2  ;;  %v68_v6 = vld [vmem:[#allocation3] sm:$0xff]  ;;  %v75_v8 = vld [vmem:[#allocation6 + $0x28] sm:$0xff]  ;;  %v77_v11 = vld [vmem:[#allocation6 + $0x38] sm:$0xff]  ;;  %s350_s23 = scalar_lea.vmem %s180_s22, 256  ;;  %p355_p11 = scmp.lt.s32.totalorder %s180_s22, %s180_s22 }
  0x3a   :  { %247 = vmatprep.subr.bf16.mxu0 %v246_v3  ;;  %243 = vmatprep.mubr.f32.mxu0 %v68_v6  ;;  %v254_v9 = vpack.c.bf16 %v75_v8, %v74_v7  ;;  %v76_v10 = vld [vmem:[#allocation6 + $0x30] sm:$0xff]  ;;  %v78_v13 = vld [vmem:[#allocation6 + $0x40] sm:$0xff]  ;;  %v79_v14 = vld [vmem:[#allocation6 + $0x48] sm:$0xff]  ;;  %p351_p10 = scmp.ne.s32.totalorder %s180_s22, %s350_s23  ;;  %p356_p12 = scmp.lt.s32.totalorder %s350_s23, %s350_s23 }
  0x3b   :  { %249 = vmatpush3.bf16.xpose.msra.mxu0 %v246_v3  ;;  %v258_v12 = vpack.c.bf16 %v77_v11, %v76_v10  ;;  %v262_v15 = vpack.c.bf16 %v79_v14, %v78_v13  ;;  %v80_v16 = vld [vmem:[#allocation6 + $0x50] sm:$0xff]  ;;  %v81_v17 = vld [vmem:[#allocation6 + $0x58] sm:$0xff]  ;;  %v82_v19 = vld [vmem:[#allocation6 + $0x60] sm:$0xff] }
  0x3c   :  { %251 = vmatprep.subr.bf16.mxu0 %v250_v5  ;;  %v266_v18 = vpack.c.bf16 %v81_v17, %v80_v16  ;;  %v83_v20 = vld [vmem:[#allocation6 + $0x68] sm:$0xff]  ;;  %v84_v22 = vld [vmem:[#allocation6 + $0x70] sm:$0xff]  ;;  %v85_v23 = vld [vmem:[#allocation6 + $0x78] sm:$0xff]  ;;  %p357_p13 = por %p356_p12, %p355_p11 }
  0x3d   :  { %v270_v21 = vpack.c.bf16 %v83_v20, %v82_v19  ;;  %v274_v24 = vpack.c.bf16 %v85_v23, %v84_v22  ;;  %v69_v25 = vld [vmem:[#allocation3 + $0x8] sm:$0xff]  ;;  %v192_v26 = vld [vmem:[#allocation8] ss:$0 sm:$0xff] }
  0x3e   :  { %p358_p0 = pnand %p357_p13, %p351_p10 }
  0x43   :  { %253 = vmatpush3.bf16.xpose.msra.mxu0 %v250_v5 }
  0x44   :  { %255 = vmatprep.subr.bf16.mxu0 %v254_v9 }
  0x4b   :  { %257 = vmatpush3.bf16.xpose.msra.mxu0 %v254_v9 }
  0x4c   :  { %259 = vmatprep.subr.bf16.mxu0 %v258_v12 }
  0x53   :  { %261 = vmatpush3.bf16.xpose.msra.mxu0 %v258_v12 }
  0x54   :  { %263 = vmatprep.subr.bf16.mxu0 %v262_v15 }
  0x5b   :  { %265 = vmatpush3.bf16.xpose.msra.mxu0 %v262_v15 }
  0x5c   :  { %267 = vmatprep.subr.bf16.mxu0 %v266_v18 }
  0x63   :  { %269 = vmatpush3.bf16.xpose.msra.mxu0 %v266_v18 }
  0x64   :  { %271 = vmatprep.subr.bf16.mxu0 %v270_v21 }
  0x6b   :  { %273 = vmatpush3.bf16.xpose.msra.mxu0 %v270_v21 }
  0x6c   :  { %275 = vmatprep.subr.bf16.mxu0 %v274_v24 }
  0x73   :  { %277 = vmatpush3.bf16.xpose.msra.mxu0 %v274_v24 }
  0x7a   :  { %244 = vmatmul.mubr.f32.vlgmr.msra.gmra.mrb[0].mxu0 %v69_v25 }
 0x14d   :  { %v245_v27 = vpop.f32.mrb[0].mxu0 }
 0x14e   :  { %v164_v28 = vadd.f32 %v245_v27, %v192_v26  ;;  %v154_v29 = vpop.f32.mrb[1].mxu0 }
 0x14f   :  { %v163_v30 = vadd.f32 %v192_v26, %v154_v29 }
 0x150   :  { %173 = vst [vmem:[#allocation9 + $0x8] sm:$0xff] %v164_v28 }
 0x151   :  { %172 = vst [vmem:[#allocation9] sm:$0xff] %v163_v30 }
 0x152   :  { %361 = shalt.err (!%p358_p0)
}
 0x153   :  { %s362_s28 = scalar_lea.hbm %s471_s3, 256 }
 0x154   :  { %p363_p1 = scmp.ne.s32.totalorder %s471_s3, %s362_s28  ;;  %p366_p2 = scmp.lt.u32.totalorder %s362_s28, %s471_s3 }
 0x156   :  { %p368_p3 = pnand %p366_p2, %p363_p1 }
 0x158   :  { %371 = shalt.err (!%p368_p3)
}
 0x159   :  { %185 = dma.vmem_to_hbm [thread:$0]  %s180_s22, 256, %s471_s3, [#allocation5], %s380_s24, %s380_s24, %s381_s25  }
 0x15a   :  { %376 = dma.done.wait [#allocation5], 256  }
 0x15b   :  { %377 = vsyncadd [#allocation5], 4294967040 }
 0x15c   :  { %189 = vsyncpa [#allocation4], 1 }
 0x15d   :  { %190 = vsyncpa [#allocation7], 1 }
 0x15e   :  { %191 = vsyncpa [#allocation5], 1 }

</bundles_post_ra>
